<compile_context>
chip_gen: v6e
topology: v6e:2x2x1
jax: 0.10.0
libtpu: 0.0.40
codegen_flags: <defaults>
</compile_context>

<pallas_src>
import functools

import jax
import jax.numpy as jnp
from jax.experimental import pallas as pl
from jax.experimental.pallas import tpu as pltpu

_ACC_BUDGET_ELEMS = 16 * 1024  # per-chunk f32 accumulator <= 16 vregs


def _round_up(v, m):
    return (v + m - 1) // m * m


@functools.lru_cache(maxsize=None)
def _vmem_limit_bytes():
    """Per-generation scoped-VMEM limit (v5e/v6e: 128 MiB, v7x: 64 MiB phys)."""
    cap = 64 << 20  # conservative fallback, safe on every generation
    try:
        info = pltpu.get_tpu_info()
        cap = int(getattr(info, "vmem_capacity_bytes", cap))
    except Exception:
        pass
    return min(cap * 3 // 4, 96 << 20)


@functools.lru_cache(maxsize=None)
def _roll_matches_jnp_roll():
    """pltpu.roll follows jnp.roll semantics in current JAX; probe once on the
    device so a convention change across versions cannot silently flip the
    conv taps.  Must be called eagerly (outside jit)."""
    def k(x_ref, o_ref):
        o_ref[...] = pltpu.roll(x_ref[...], shift=1, axis=0)

    x = jax.lax.broadcasted_iota(jnp.float32, (8, 128), 0)
    y = pl.pallas_call(
        k, out_shape=jax.ShapeDtypeStruct((8, 128), jnp.float32))(x)
    return bool(jax.device_get(y)[0, 0] == 7.0)


def _pick_row_chunk(H, W, tco, pool):
    """Largest row chunk whose f32 accumulator stays ~<=16 vregs."""
    rh = H
    min_rh = 2 if pool else 1
    while rh * W * tco > _ACC_BUDGET_ELEMS:
        nxt = rh // 2
        if rh % 2 != 0 or nxt < min_rh or (pool and nxt % 2 != 0):
            break
        rh = nxt
    return rh


# ----------------------------------------------------------------------------
# Pallas kernel: 3x3 conv + bias + ReLU (+ optional fused 2x2/2 max-pool)
# ----------------------------------------------------------------------------
def _conv3x3_relu_kernel(x_ref, w_ref, b_ref, o_ref, *, H, W, Cin, TCO,
                         dil, RH, Wpad, pool, roll_is_jnp):
    """One (image, Cout-tile) grid cell.

    x_ref : (1, H + 2*dil, Wpad, Cin)  zero-padded bf16 input
    w_ref : (3, 3, Cin, TCO)           bf16 weights
    b_ref : (1, TCO)                   f32 bias
    o_ref : (1, H, W, TCO) or (1, H//2, W//2, TCO)  bf16
    """
    bias = b_ref[...]                                   # (1, TCO) f32
    n_chunks = H // RH
    for c in range(n_chunks):
        r0 = c * RH
        # Rows of the padded input feeding this chunk of output rows
        # (leading-dim slice -> no relayout).
        rows = x_ref[0, r0:r0 + RH + 2 * dil, :, :]     # (RH+2d, Wpad, Cin)
        acc = jnp.zeros((RH * W, TCO), jnp.float32)
        for dx in range(3):
            k = dx * dil
            if k == 0:
                shifted = rows
            else:
                # Bring column k to column 0 with an XLU roll (no misaligned
                # sublane slice / VMEM copy).  The circular wrap only touches
                # columns >= W, which are never read below.
                shift = (Wpad - k) if roll_is_jnp else k
                shifted = pltpu.roll(rows, shift=shift, axis=1)
            for dy in range(3):
                patch = shifted[dy * dil:dy * dil + RH, :W, :]   # (RH, W, Cin)
                # MXU matmul, f32 accumulation kept in registers per chunk.
                acc = acc + jnp.dot(
                    patch.reshape(RH * W, Cin),
                    w_ref[dy, dx],
                    preferred_element_type=jnp.float32)
        v = jnp.maximum(acc + bias, 0.0).reshape(RH, W, TCO)
        if pool:
            # Fused MaxPool2d(2, 2): pool H (leading dim, layout-free), then W
            # via a reshape-reduce on the in-VMEM tile.
            v = jnp.max(v.reshape(RH // 2, 2, W, TCO), axis=1)
            v = jnp.max(v.reshape(RH // 2, W // 2, 2, TCO), axis=2)
            o_ref[0, r0 // 2:(r0 + RH) // 2, :, :] = v.astype(o_ref.dtype)
        else:
            o_ref[0, r0:r0 + RH, :, :] = v.astype(o_ref.dtype)


# ----------------------------------------------------------------------------
# Pallas wrapper
# ----------------------------------------------------------------------------
def conv3x3_relu_nhwc(x, w, b, *, dilation=1, pool=False):
    """x: (N,H,W,Cin) bf16, w: (3,3,Cin,Cout) bf16, b: (Cout,) f32.

    'same' 3x3 conv (given dilation) + bias + ReLU, optionally followed by a
    fused MaxPool2d(kernel=2, stride=2).
    """
    N, H, W, Cin = x.shape
    Cout = w.shape[-1]
    d = int(dilation)
    if pool:
        assert H % 2 == 0 and W % 2 == 0, "fused pool needs even H, W"

    # Cout tile: extra parallel grid axis; 128/256 keeps the MXU N dim full
    # (v5e's 128-wide MXU and v6e/v7x's 256-wide are both served) and bounds
    # per-step VMEM.  Memory-bound at these sizes, so either width is fine.
    if Cout % 256 == 0:
        tco = 256
    elif Cout % 128 == 0:
        tco = 128
    else:
        tco = Cout

    rh = _pick_row_chunk(H, W, tco, pool)
    assert H % rh == 0

    # Zero 'same' padding; right-pad the width so the padded width is
    # sublane(8)-aligned -> every in-kernel slice / roll stays tile aligned.
    wpad = max(_round_up(W + 2 * d, 8), 8)
    xp = jnp.pad(x, ((0, 0), (d, d), (d, wpad - W - d), (0, 0)))
    hp = H + 2 * d

    ho, wo = (H // 2, W // 2) if pool else (H, W)
    b2 = b.reshape(1, Cout).astype(jnp.float32)

    kern = functools.partial(
        _conv3x3_relu_kernel, H=H, W=W, Cin=Cin, TCO=tco, dil=d, RH=rh,
        Wpad=wpad, pool=pool, roll_is_jnp=_roll_matches_jnp_roll())

    return pl.pallas_call(
        kern,
        out_shape=jax.ShapeDtypeStruct((N, ho, wo, Cout), x.dtype),
        grid=(N, Cout // tco),
        in_specs=[
            pl.BlockSpec((1, hp, wpad, Cin), lambda n, co: (n, 0, 0, 0)),
            pl.BlockSpec((3, 3, Cin, tco), lambda n, co: (0, 0, 0, co)),
            pl.BlockSpec((1, tco), lambda n, co: (0, co)),
        ],
        out_specs=pl.BlockSpec((1, ho, wo, tco), lambda n, co: (n, 0, 0, co)),
        compiler_params=pltpu.CompilerParams(
            dimension_semantics=("parallel", "parallel"),
            vmem_limit_bytes=_vmem_limit_bytes()),
    )(xp, w, b2)


# ----------------------------------------------------------------------------
# VGG model (parameters + forward orchestration; conv/relu/pool run in Pallas)
# ----------------------------------------------------------------------------
def _kaiming_conv(key, cin, cout):
    # kaiming_init(mode='fan_out', nonlinearity='relu'); bias randomized here
    # (mmcv default is 0) purely to exercise the bias path in the check.
    wkey, bkey = jax.random.split(key)
    fan_out = 3 * 3 * cout
    std = (2.0 / fan_out) ** 0.5
    w = (jax.random.normal(wkey, (3, 3, cin, cout), jnp.float32) * std)
    b = jax.random.normal(bkey, (cout,), jnp.float32) * 0.1
    return w.astype(jnp.bfloat16), b  # bf16 weights, f32 bias


class VGGPallas:
    """with_bn=False inference path; BN / frozen-stage / train-mode logic has
    no effect on this forward pass."""

    arch_settings = {11: (1, 1, 2, 2, 2), 13: (2, 2, 2, 2, 2),
                     16: (2, 2, 3, 3, 3), 19: (2, 2, 4, 4, 4)}

    def __init__(self, depth, num_stages=5, dilations=(1, 1, 1, 1, 1),
                 out_indices=(0, 1, 2, 3), with_last_pool=True, key=None):
        assert depth in self.arch_settings
        assert 1 <= num_stages <= 5
        self.stage_blocks = self.arch_settings[depth][:num_stages]
        assert len(dilations) == num_stages
        assert max(out_indices) <= num_stages
        self.dilations = dilations
        self.out_indices = out_indices
        self.with_last_pool = with_last_pool

        # Prime device-probing caches eagerly (must not run under jit tracing).
        _roll_matches_jnp_roll()
        _vmem_limit_bytes()

        inplanes = 3
        self.stage_params = []
        for i, num_blocks in enumerate(self.stage_blocks):
            planes = 64 * 2 ** i if i < 4 else 512
            blocks = []
            for _ in range(num_blocks):
                key, sub = jax.random.split(key)
                blocks.append(_kaiming_conv(sub, inplanes, planes))
                inplanes = planes
            self.stage_params.append(blocks)

    def __call__(self, x_nchw):
        x = jnp.transpose(x_nchw, (0, 2, 3, 1)).astype(jnp.bfloat16)
        outs = []
        n_stages = len(self.stage_blocks)
        for i, blocks in enumerate(self.stage_params):
            d = self.dilations[i]
            has_pool = (i < n_stages - 1) or self.with_last_pool
            for j, (w, b) in enumerate(blocks):
                fuse_pool = has_pool and (j == len(blocks) - 1)
                x = conv3x3_relu_nhwc(x, w, b, dilation=d, pool=fuse_pool)
            if i in self.out_indices:
                outs.append(jnp.transpose(x, (0, 3, 1, 2)).astype(jnp.float32))
        return tuple(outs)

    # Pure-JAX/XLA reference with the same precision policy (bf16 storage,
    # f32 accumulation) — for correctness verification only.
    def reference(self, x_nchw):
        x = jnp.transpose(x_nchw, (0, 2, 3, 1)).astype(jnp.bfloat16)
        outs = []
        n_stages = len(self.stage_blocks)
        for i, blocks in enumerate(self.stage_params):
            d = self.dilations[i]
            for w, b in blocks:
                y = jax.lax.conv_general_dilated(
                    x, w, window_strides=(1, 1), padding=[(d, d), (d, d)],
                    rhs_dilation=(d, d),
                    dimension_numbers=('NHWC', 'HWIO', 'NHWC'),
                    preferred_element_type=jnp.float32)
                x = jnp.maximum(y + b, 0.0).astype(jnp.bfloat16)
            if i < n_stages - 1 or self.with_last_pool:
                n_, h_, w_, c_ = x.shape
                x = x.reshape(n_, h_ // 2, 2, w_ // 2, 2, c_).max(axis=(2, 4))
            if i in self.out_indices:
                outs.append(jnp.transpose(x, (0, 3, 1, 2)).astype(jnp.float32))
        return tuple(outs)


if __name__ == "__main__":
    key = jax.random.PRNGKey(0)
    pkey, xkey = jax.random.split(key)

    model = VGGPallas(depth=11, key=pkey)

    # Small input consistent with the module: NCHW, 3 input channels,
    # 32x32 spatial so all 5 stages (incl. the final 2x2 pool) are valid.
    x = jax.random.normal(xkey, (2, 3, 32, 32), jnp.float32)

    fwd = jax.jit(model.__call__)
    outs = jax.block_until_ready(fwd(x))

    refs = model.reference(x)
    expected_shapes = [(2, 64, 16, 16), (2, 128, 8, 8),
                       (2, 256, 4, 4), (2, 512, 2, 2)]
    assert len(outs) == len(expected_shapes)
    for o, r, s in zip(outs, refs, expected_shapes):
        assert o.shape == s, (o.shape, s)
        scale = float(jnp.max(jnp.abs(r))) + 1e-6
        err = float(jnp.max(jnp.abs(o - r))) / scale
        assert err < 2e-2, f"max normalized error {err}"

    print("KERNEL_OK")
</pallas_src>

<mosaic_0001>
module attributes {stable_mosaic.version = 11 : i64} {
  func.func @k(%arg0: memref<8x128xf32, #tpu.memory_space<vmem>>, %arg1: memref<8x128xf32, #tpu.memory_space<vmem>>) attributes {dimension_semantics = [], scalar_prefetch = 0 : i64, scratch_operands = 0 : i64, tpu.core_type = #tpu.core_type<tc>} {
    %c0 = arith.constant 0 : index
    %c0_0 = arith.constant 0 : index
    %0 = vector.load %arg0[%c0, %c0_0] : memref<8x128xf32, #tpu.memory_space<vmem>>, vector<8x128xf32>
    %c1_i32 = arith.constant 1 : i32
    %1 = tpu.dynamic_rotate %0 by %c1_i32 dim 0 : vector<8x128xf32>, i32 -> vector<8x128xf32>
    %c0_1 = arith.constant 0 : index
    %c0_2 = arith.constant 0 : index
    %2 = vector.load %arg1[%c0_1, %c0_2] : memref<8x128xf32, #tpu.memory_space<vmem>>, vector<8x128xf32>
    tpu.vector_store %arg1[%c0_1, %c0_2], %1 {strides = array<i32>} : memref<8x128xf32, #tpu.memory_space<vmem>>, vector<8x128xf32>,
    return
  }
}

</mosaic_0001>

<bundles_post_ra>
// kernel: tpu_custom_call.1
= control target key start
LH: loop header
LB: loop body
LE: loop exit
PB: predicated region body
PF: predicated region fallthrough
CT: control target
= control target key end

     0   :  { %6 = vsyncpa [#allocation3], 0  ;;  %s103_s0 = inlined_call_operand.hbm [shape: f32[8,128], index: 0, kind: input, shape index: {}]   ;;  %s104_s1 = inlined_call_operand.hbm [shape: f32[8,128], index: 1, kind: output, shape index: {}]  }
   0x1   :  { %7 = vsyncpa [#allocation4], 0  ;;  %s85_s6 = smov [#allocation2]  }
   0x2   :  { %s14_s7 = sshll.u32 %s85_s6, 4  ;;  %s15_s7 = int_to_ptr.vmem [resolvable:$true] %s14_s7 }
   0x3   :  { %s49_s8 = scalar_lea.vmem %s15_s7, 128  ;;  %p54_p1 = scmp.lt.s32.totalorder %s15_s7, %s15_s7 }
   0x4   :  { %p50_p0 = scmp.ne.s32.totalorder %s15_s7, %s49_s8  ;;  %p55_p2 = scmp.lt.s32.totalorder %s49_s8, %s49_s8 }
   0x6   :  { %p56_p3 = por %p55_p2, %p54_p1 }
   0x8   :  { %p57_p4 = pnand %p56_p3, %p50_p0 }
   0xa   :  { %60 = shalt.err (!%p57_p4)
}
   0xb   :  { %17 = dma.hbm_to_vmem [thread:$0]  %s103_s0, 128, %s15_s7, [#allocation3]  }
   0xc   :  { %81 = dma.done.wait [#allocation3], 128  }
   0xd   :  { %82 = vsyncadd [#allocation3], 4294967168  ;;  %s86_s11 = smov [#allocation5]   ;;  %v21_v0 = vld [vmem:[#allocation2] sm:$0xff] }
   0xe   :  { %s30_s12 = sshll.u32 %s86_s11, 4  ;;  %v22_v1 = vrot.slane %v21_v0, 7  ;;  %s31_s12 = int_to_ptr.vmem [resolvable:$true] %s30_s12 }
   0xf   :  { %s61_s13 = scalar_lea.vmem %s31_s12, 128  ;;  %p66_p6 = scmp.lt.s32.totalorder %s31_s12, %s31_s12 }
  0x10   :  { %23 = vst [vmem:[#allocation5] sm:$0xff] %v22_v1  ;;  %p62_p5 = scmp.ne.s32.totalorder %s31_s12, %s61_s13  ;;  %p67_p7 = scmp.lt.s32.totalorder %s61_s13, %s61_s13 }
  0x12   :  { %p68_p8 = por %p67_p7, %p66_p6 }
  0x14   :  { %p69_p9 = pnand %p68_p8, %p62_p5 }
  0x16   :  { %72 = shalt.err (!%p69_p9)
}
  0x17   :  { %33 = dma.vmem_to_hbm [thread:$0]  %s31_s12, 128, %s104_s1, [#allocation4]  }
  0x18   :  { %83 = dma.done.wait [#allocation4], 128  }
  0x19   :  { %84 = vsyncadd [#allocation4], 4294967168 }
  0x1a   :  { %37 = vsyncpa [#allocation3], 1 }
  0x1b   :  { %38 = vsyncpa [#allocation4], 1 }

</bundles_post_ra>
